<compile_context>
chip_gen: v6e
topology: v6e:2x2x1
jax: 0.10.0
libtpu: 0.0.40
codegen_flags: <defaults>
</compile_context>

<pallas_src>
import functools

import jax
import jax.numpy as jnp
from jax.experimental import pallas as pl
from jax.experimental.pallas import tpu as pltpu


def _round_up(x: int, m: int) -> int:
    return ((x + m - 1) // m) * m


def _apply_activation(y, activation):
    # y is f32; keep the non-linearity in f32 (relu -> VPU, tanh/sigmoid -> EUP).
    if activation == "relu":
        return jnp.maximum(y, 0.0)
    if activation == "tanh":
        return jnp.tanh(y)
    if activation == "sigmoid":
        return jax.nn.sigmoid(y)
    raise ValueError(f"bad activation {activation}")


def _fused_mlp_kernel(x_ref, *refs, num_layers, activation):
    """Fused MLP: refs = (w0, b0, w1, b1, ..., w_{L-1}, b_{L-1}, o).

    x_ref : [TB, in_p]        bf16 (padded features)
    w_l   : [in_p_l, out_p_l] bf16 (pre-transposed, zero-padded)
    b_l   : [1, out_p_l]      f32  (zero-padded)
    o_ref : [TB, out_p_last]  f32  (lane-dense, padded to 128)
    """
    o_ref = refs[-1]
    wb = refs[:-1]
    h = x_ref[...]
    for l in range(num_layers):
        w = wb[2 * l][...]
        b = wb[2 * l + 1][...]
        y = jnp.dot(h, w, preferred_element_type=jnp.float32) + b
        if l < num_layers - 1:
            y = _apply_activation(y, activation)
            h = y.astype(w.dtype)          # back to bf16 for the next MXU pass
        else:
            o_ref[...] = y.astype(o_ref.dtype)


def mlp_forward_pallas(params, images, *, activation, num_classes,
                       max_batch_tile=512):
    """params: tuple of (w_pad [in_p, out_p] bf16, b_pad [1, out_p] f32)."""
    B = images.shape[0]
    x = images.reshape(B, -1).astype(params[0][0].dtype)   # flatten + bf16 cast

    in_p = params[0][0].shape[0]
    feat = x.shape[1]

    # Pad batch to a bf16-sublane-friendly multiple and pick the batch tile.
    Bp = _round_up(max(B, 1), 16)
    TB = min(max_batch_tile, Bp)
    Bp = _round_up(Bp, TB)

    # Single fused pad (features to 128-aligned width, batch to tile multiple).
    if Bp != B or feat != in_p:
        x = jnp.pad(x, ((0, Bp - B), (0, in_p - feat)))

    out_p = params[-1][0].shape[1]
    num_layers = len(params)

    kernel = functools.partial(_fused_mlp_kernel,
                               num_layers=num_layers, activation=activation)

    in_specs = [pl.BlockSpec((TB, in_p), lambda i: (i, 0))]
    flat_params = []
    flops = 0
    bytes_accessed = Bp * in_p * 2 + Bp * out_p * 4
    for w, b in params:
        # Constant index_map -> weights/biases stay VMEM-resident across the grid.
        in_specs.append(pl.BlockSpec(w.shape, lambda i: (0, 0)))
        in_specs.append(pl.BlockSpec(b.shape, lambda i: (0, 0)))
        flat_params.append(w)
        flat_params.append(b)
        flops += 2 * Bp * w.shape[0] * w.shape[1]
        bytes_accessed += w.size * 2 + b.size * 4

    out = pl.pallas_call(
        kernel,
        out_shape=jax.ShapeDtypeStruct((Bp, out_p), jnp.float32),
        grid=(Bp // TB,),
        in_specs=in_specs,
        out_specs=pl.BlockSpec((TB, out_p), lambda i: (i, 0)),
        compiler_params=pltpu.CompilerParams(
            dimension_semantics=("parallel",),
            vmem_limit_bytes=32 * 1024 * 1024,
        ),
        cost_estimate=pl.CostEstimate(
            flops=flops, transcendentals=0, bytes_accessed=bytes_accessed),
    )(x, *flat_params)

    return out[:B, :num_classes]


class MLPPallas:
    """JAX/Pallas re-implementation of the PyTorch MLP module (fused forward)."""

    def __init__(self, input_size, hidden_sizes, num_classes,
                 activation="relu", key=None, param_dtype=jnp.bfloat16):
        assert len(hidden_sizes) > 1, "You should at least have one hidden layer"
        assert activation in ("tanh", "relu", "sigmoid")
        if key is None:
            key = jax.random.PRNGKey(0)
        self.activation = activation
        self.num_classes = num_classes

        sizes = [input_size] + list(hidden_sizes) + [num_classes]
        self.params = []       # padded, transposed kernel params
        self.ref_params = []   # unpadded [in, out] params for the JAX reference
        for in_f, out_f in zip(sizes[:-1], sizes[1:]):
            key, sub = jax.random.split(key)
            # Xavier (Glorot) normal init, zero bias (matches the PyTorch module).
            std = (2.0 / (in_f + out_f)) ** 0.5
            w = std * jax.random.normal(sub, (out_f, in_f), jnp.float32)
            wt = w.T                                   # pre-transpose -> [in, out]
            in_p = _round_up(in_f, 128)
            out_p = _round_up(out_f, 128)
            w_pad = jnp.zeros((in_p, out_p), jnp.float32).at[:in_f, :out_f].set(wt)
            w_pad = w_pad.astype(param_dtype)
            b_pad = jnp.zeros((1, out_p), jnp.float32)  # bias kept f32, lane-padded
            self.params.append((w_pad, b_pad))
            self.ref_params.append((wt.astype(param_dtype),
                                    jnp.zeros((out_f,), jnp.float32)))

        # One compiled program for the whole forward pass (reshape+pad+kernel+slice).
        self._forward = jax.jit(functools.partial(
            mlp_forward_pallas,
            activation=activation,
            num_classes=num_classes))

    def __call__(self, images):
        return self._forward(tuple(self.params), images)


if __name__ == "__main__":
    key = jax.random.PRNGKey(0)
    k_img, k_params = jax.random.split(key)

    batch, channels, width, height = 2, 4, 16, 16
    input_size = channels * width * height  # 1024
    hidden_sizes = [32, 32]
    num_classes = 10

    images = jax.random.normal(k_img, (batch, channels, width, height), jnp.float32)

    model = MLPPallas(input_size, hidden_sizes, num_classes,
                      activation="relu", key=k_params)

    logits = model(images)
    logits = jax.block_until_ready(logits)
    assert logits.shape == (batch, num_classes)

    # Sanity check against a plain-JAX reference with matching numerics
    # (bf16 matmuls, f32 accumulation, f32 activations).
    x_ref = images.reshape(batch, -1).astype(jnp.bfloat16)
    for wt, bvec in model.ref_params[:-1]:
        y = jnp.dot(x_ref, wt, preferred_element_type=jnp.float32) + bvec
        y = jnp.maximum(y, 0.0)
        x_ref = y.astype(jnp.bfloat16)
    wt, bvec = model.ref_params[-1]
    ref = jnp.dot(x_ref, wt, preferred_element_type=jnp.float32) + bvec
    assert jnp.allclose(logits, ref, atol=2e-2, rtol=2e-2), (
        float(jnp.max(jnp.abs(logits - ref))))

    print("KERNEL_OK")
</pallas_src>

<mosaic_0001>
module attributes {stable_mosaic.version = 11 : i64} {
  func.func @_fused_mlp_kernel(%arg0: i32, %arg1: memref<16x1024xbf16, #tpu.memory_space<vmem>>, %arg2: memref<1024x128xbf16, #tpu.memory_space<vmem>>, %arg3: memref<1x128xf32, #tpu.memory_space<vmem>>, %arg4: memref<128x128xbf16, #tpu.memory_space<vmem>>, %arg5: memref<1x128xf32, #tpu.memory_space<vmem>>, %arg6: memref<128x128xbf16, #tpu.memory_space<vmem>>, %arg7: memref<1x128xf32, #tpu.memory_space<vmem>>, %arg8: memref<16x128xf32, #tpu.memory_space<vmem>>) attributes {dimension_semantics = [#tpu.dimension_semantics<parallel>], iteration_bounds = array<i64: 1>, scalar_prefetch = 0 : i64, scratch_operands = 0 : i64, tpu.core_type = #tpu.core_type<tc>, window_params = [{transform_indices = @transform_0, window_bounds = array<i64: 16, 1024>}, {pipeline_mode = #tpu.pipeline_mode<synchronous>, transform_indices = @transform_1, window_bounds = array<i64: 1024, 128>}, {pipeline_mode = #tpu.pipeline_mode<synchronous>, transform_indices = @transform_2, window_bounds = array<i64: 1, 128>}, {pipeline_mode = #tpu.pipeline_mode<synchronous>, transform_indices = @transform_3, window_bounds = array<i64: 128, 128>}, {pipeline_mode = #tpu.pipeline_mode<synchronous>, transform_indices = @transform_4, window_bounds = array<i64: 1, 128>}, {pipeline_mode = #tpu.pipeline_mode<synchronous>, transform_indices = @transform_5, window_bounds = array<i64: 128, 128>}, {pipeline_mode = #tpu.pipeline_mode<synchronous>, transform_indices = @transform_6, window_bounds = array<i64: 1, 128>}, {transform_indices = @transform_7, window_bounds = array<i64: 16, 128>}]} {
    %c0 = arith.constant 0 : index
    %c0_0 = arith.constant 0 : index
    %0 = vector.load %arg1[%c0, %c0_0] : memref<16x1024xbf16, #tpu.memory_space<vmem>>, vector<16x1024xbf16>
    %c0_1 = arith.constant 0 : index
    %c0_2 = arith.constant 0 : index
    %1 = vector.load %arg2[%c0_1, %c0_2] : memref<1024x128xbf16, #tpu.memory_space<vmem>>, vector<1024x128xbf16>
    %c0_3 = arith.constant 0 : index
    %c0_4 = arith.constant 0 : index
    %2 = vector.load %arg3[%c0_3, %c0_4] : memref<1x128xf32, #tpu.memory_space<vmem>>, vector<1x128xf32>
    %cst = arith.constant dense<0.000000e+00> : vector<16x128xf32>
    %3 = tpu.matmul %0, %1, %cst {dimension_numbers = #tpu.dot_dimension_numbers<[1], [0], [0], [1], [0, 0, 1, 1], [], []>} : vector<16x1024xbf16>, vector<1024x128xbf16>, vector<16x128xf32> -> vector<16x128xf32>
    %4 = vector.broadcast %2 : vector<1x128xf32> to vector<16x128xf32>
    %5 = arith.addf %3, %4 : vector<16x128xf32>
    %cst_5 = arith.constant 0.000000e+00 : f32
    %6 = vector.broadcast %cst_5 : f32 to vector<16x128xf32>
    %7 = arith.maximumf %5, %6 : vector<16x128xf32>
    %8 = arith.truncf %7 : vector<16x128xf32> to vector<16x128xbf16>
    %c0_6 = arith.constant 0 : index
    %c0_7 = arith.constant 0 : index
    %9 = vector.load %arg4[%c0_6, %c0_7] : memref<128x128xbf16, #tpu.memory_space<vmem>>, vector<128x128xbf16>
    %c0_8 = arith.constant 0 : index
    %c0_9 = arith.constant 0 : index
    %10 = vector.load %arg5[%c0_8, %c0_9] : memref<1x128xf32, #tpu.memory_space<vmem>>, vector<1x128xf32>
    %cst_10 = arith.constant dense<0.000000e+00> : vector<16x128xf32>
    %11 = tpu.matmul %8, %9, %cst_10 {dimension_numbers = #tpu.dot_dimension_numbers<[1], [0], [0], [1], [0, 0, 1, 1], [], []>} : vector<16x128xbf16>, vector<128x128xbf16>, vector<16x128xf32> -> vector<16x128xf32>
    %12 = vector.broadcast %10 : vector<1x128xf32> to vector<16x128xf32>
    %13 = arith.addf %11, %12 : vector<16x128xf32>
    %cst_11 = arith.constant 0.000000e+00 : f32
    %14 = vector.broadcast %cst_11 : f32 to vector<16x128xf32>
    %15 = arith.maximumf %13, %14 : vector<16x128xf32>
    %16 = arith.truncf %15 : vector<16x128xf32> to vector<16x128xbf16>
    %c0_12 = arith.constant 0 : index
    %c0_13 = arith.constant 0 : index
    %17 = vector.load %arg6[%c0_12, %c0_13] : memref<128x128xbf16, #tpu.memory_space<vmem>>, vector<128x128xbf16>
    %c0_14 = arith.constant 0 : index
    %c0_15 = arith.constant 0 : index
    %18 = vector.load %arg7[%c0_14, %c0_15] : memref<1x128xf32, #tpu.memory_space<vmem>>, vector<1x128xf32>
    %cst_16 = arith.constant dense<0.000000e+00> : vector<16x128xf32>
    %19 = tpu.matmul %16, %17, %cst_16 {dimension_numbers = #tpu.dot_dimension_numbers<[1], [0], [0], [1], [0, 0, 1, 1], [], []>} : vector<16x128xbf16>, vector<128x128xbf16>, vector<16x128xf32> -> vector<16x128xf32>
    %20 = vector.broadcast %18 : vector<1x128xf32> to vector<16x128xf32>
    %21 = arith.addf %19, %20 : vector<16x128xf32>
    %c0_17 = arith.constant 0 : index
    %c0_18 = arith.constant 0 : index
    %22 = vector.load %arg8[%c0_17, %c0_18] : memref<16x128xf32, #tpu.memory_space<vmem>>, vector<16x128xf32>
    tpu.vector_store %arg8[%c0_17, %c0_18], %21 {strides = array<i32>} : memref<16x128xf32, #tpu.memory_space<vmem>>, vector<16x128xf32>,
    return
  }
  func.func @transform_0(%arg0: i32) -> (i32, i32) {
    %c0_i32 = arith.constant 0 : i32
    %c0_i32_0 = arith.constant 0 : i32
    return %arg0, %c0_i32 : i32, i32
  }
  func.func @transform_1(%arg0: i32) -> (i32, i32) {
    %c0_i32 = arith.constant 0 : i32
    %c0_i32_0 = arith.constant 0 : i32
    %c0_i32_1 = arith.constant 0 : i32
    return %c0_i32, %c0_i32_0 : i32, i32
  }
  func.func @transform_2(%arg0: i32) -> (i32, i32) {
    %c0_i32 = arith.constant 0 : i32
    %c0_i32_0 = arith.constant 0 : i32
    %c0_i32_1 = arith.constant 0 : i32
    return %c0_i32, %c0_i32_0 : i32, i32
  }
  func.func @transform_3(%arg0: i32) -> (i32, i32) {
    %c0_i32 = arith.constant 0 : i32
    %c0_i32_0 = arith.constant 0 : i32
    %c0_i32_1 = arith.constant 0 : i32
    return %c0_i32, %c0_i32_0 : i32, i32
  }
  func.func @transform_4(%arg0: i32) -> (i32, i32) {
    %c0_i32 = arith.constant 0 : i32
    %c0_i32_0 = arith.constant 0 : i32
    %c0_i32_1 = arith.constant 0 : i32
    return %c0_i32, %c0_i32_0 : i32, i32
  }
  func.func @transform_5(%arg0: i32) -> (i32, i32) {
    %c0_i32 = arith.constant 0 : i32
    %c0_i32_0 = arith.constant 0 : i32
    %c0_i32_1 = arith.constant 0 : i32
    return %c0_i32, %c0_i32_0 : i32, i32
  }
  func.func @transform_6(%arg0: i32) -> (i32, i32) {
    %c0_i32 = arith.constant 0 : i32
    %c0_i32_0 = arith.constant 0 : i32
    %c0_i32_1 = arith.constant 0 : i32
    return %c0_i32, %c0_i32_0 : i32, i32
  }
  func.func @transform_7(%arg0: i32) -> (i32, i32) {
    %c0_i32 = arith.constant 0 : i32
    %c0_i32_0 = arith.constant 0 : i32
    return %arg0, %c0_i32 : i32, i32
  }
}

</mosaic_0001>

<bundles_post_ra>
// kernel: mlp_forward_pallas.1
= control target key start
LH: loop header
LB: loop body
LE: loop exit
PB: predicated region body
PF: predicated region fallthrough
CT: control target
= control target key end

     0   :  { %12 = vsyncpa [#allocation3], 0  ;;  %s1353_s24 = smov [#allocation2]   ;;  %s1506_s0 = inlined_call_operand.vmem [shape: bf16[16,1024], index: 0, kind: input, shape index: {}]   ;;  %s1507_s1 = inlined_call_operand.hbm [shape: bf16[1024,128], index: 1, kind: input, shape index: {}]   ;;  %s1508_s2 = inlined_call_operand.vmem [shape: f32[1,128], index: 2, kind: input, shape index: {}]   ;;  %s1509_s3 = inlined_call_operand.vmem [shape: bf16[128,128], index: 3, kind: input, shape index: {}]   ;;  %s1510_s4 = inlined_call_operand.vmem [shape: f32[1,128], index: 4, kind: input, shape index: {}]   ;;  %s1511_s5 = inlined_call_operand.vmem [shape: bf16[128,128], index: 5, kind: input, shape index: {}]   ;;  %s1512_s6 = inlined_call_operand.vmem [shape: f32[1,128], index: 6, kind: input, shape index: {}]   ;;  %s1513_s7 = inlined_call_operand.vmem [shape: f32[16,128], index: 7, kind: output, shape index: {}]  }
   0x1   :  { %s20_s25 = sshll.u32 %s1353_s24, 4  ;;  %s21_s25 = int_to_ptr.vmem [resolvable:$true] %s20_s25 }
   0x2   :  { %s1339_s26 = scalar_lea.vmem %s21_s25, 8192  ;;  %p1344_p1 = scmp.lt.s32.totalorder %s21_s25, %s21_s25 }
   0x3   :  { %p1340_p0 = scmp.ne.s32.totalorder %s21_s25, %s1339_s26  ;;  %p1345_p2 = scmp.lt.s32.totalorder %s1339_s26, %s1339_s26 }
   0x5   :  { %p1346_p3 = por %p1345_p2, %p1344_p1 }
   0x7   :  { %p1347_p4 = pnand %p1346_p3, %p1340_p0 }
   0x9   :  { %1350 = shalt.err (!%p1347_p4)
}
   0xa   :  { %s1354_s27 = smov 64   ;;  %s1355_s28 = smov 4  }
   0xb   :  { %26 = dma.hbm_to_vmem [thread:$0]  %s1507_s1, 8192, %s21_s25, [#allocation3], %s1354_s27, %s1354_s27, %s1355_s28  }
   0xc   :  { %1351 = dma.done.wait [#allocation3], 8192  }
   0xd   :  { %1352 = vsyncadd [#allocation3], 4294959104  ;;  %v1251_v0 = vld [vmem:[#allocation2 + $0x78] sm:$0xff]   ;;  %v1255_v4 = vld [vmem:[#allocation2 + $0x70] sm:$0xff]   ;;  %vm1357_vm0 = vmmov 0  }
   0xe   :  { %v1252_v1 = vld [vmem:[#allocation2 + $0xf8] sm:$0xff]   ;;  %1100 = vmatprep.subr.bf16.mxu0 %v1251_v0  ;;  %v1256_v5 = vld [vmem:[#allocation2 + $0xf0] sm:$0xff]   ;;  %v1259_v8 = vld [vmem:[#allocation2 + $0x68] sm:$0xff]  }
   0xf   :  { %v1253_v2 = vld [vmem:[#allocation2 + $0x38] sm:$0xff]   ;;  %1122 = vmatprep.subr.bf16.mxu1 %v1252_v1  ;;  %v1257_v6 = vld [vmem:[#allocation2 + $0x30] sm:$0xff]   ;;  %v1260_v9 = vld [vmem:[#allocation2 + $0xe8] sm:$0xff]  }
  0x10   :  { %v1254_v3 = vld [vmem:[#allocation2 + $0xb8] sm:$0xff]   ;;  %1101 = vmatpush3.bf16.msra.mxu0 %v1253_v2  ;;  %v1258_v7 = vld [vmem:[#allocation2 + $0xb0] sm:$0xff]   ;;  %v1261_v10 = vld [vmem:[#allocation2 + $0x28] sm:$0xff]  }
  0x11   :  { %1123 = vmatpush3.bf16.msra.mxu1 %v1254_v3  ;;  %1102 = vmatprep.subr.bf16.mxu0 %v1255_v4  ;;  %v1262_v11 = vld [vmem:[#allocation2 + $0xa8] sm:$0xff]   ;;  %v1263_v12 = vld [vmem:[#allocation2 + $0x60] sm:$0xff]   ;;  %v1267_v16 = vld [vmem:[#allocation2 + $0x58] sm:$0xff]  }
  0x12   :  { %1124 = vmatprep.subr.bf16.mxu1 %v1256_v5  ;;  %v1264_v13 = vld [vmem:[#allocation2 + $0xe0] sm:$0xff]   ;;  %v1268_v17 = vld [vmem:[#allocation2 + $0xd8] sm:$0xff]   ;;  %v1271_v20 = vld [vmem:[#allocation2 + $0x50] sm:$0xff]  }
  0x13   :  { %v1265_v14 = vld [vmem:[#allocation2 + $0x20] sm:$0xff]   ;;  %v1269_v18 = vld [vmem:[#allocation2 + $0x18] sm:$0xff]   ;;  %v1272_v21 = vld [vmem:[#allocation2 + $0xd0] sm:$0xff]  }
  0x14   :  { %1103 = vmatpush3.bf16.msra.mxu0 %v1257_v6  ;;  %v1266_v15 = vld [vmem:[#allocation2 + $0xa0] sm:$0xff]   ;;  %v1270_v19 = vld [vmem:[#allocation2 + $0x98] sm:$0xff]   ;;  %v1273_v22 = vld [vmem:[#allocation2 + $0x10] sm:$0xff]  }
  0x15   :  { %1125 = vmatpush3.bf16.msra.mxu1 %v1258_v7  ;;  %1104 = vmatprep.subr.bf16.mxu0 %v1259_v8  ;;  %v1274_v23 = vld [vmem:[#allocation2 + $0x90] sm:$0xff]   ;;  %v1275_v24 = vld [vmem:[#allocation2 + $0x48] sm:$0xff]   ;;  %v1279_v28 = vld [vmem:[#allocation2 + $0x40] sm:$0xff]  }
  0x16   :  { %1126 = vmatprep.subr.bf16.mxu1 %v1260_v9  ;;  %v1276_v25 = vld [vmem:[#allocation2 + $0xc8] sm:$0xff]   ;;  %v1280_v29 = vld [vmem:[#allocation2 + $0xc0] sm:$0xff]   ;;  %v1283_v40 = vld [vmem:[#allocation2 + $0x178] sm:$0xff]  }
  0x17   :  { %v1277_v26 = vld [vmem:[#allocation2 + $0x8] sm:$0xff]   ;;  %v1281_v30 = vld [vmem:[#allocation2] sm:$0xff]   ;;  %v1284_v41 = vld [vmem:[#allocation2 + $0x1f8] sm:$0xff]  }
  0x18   :  { %1105 = vmatpush3.bf16.msra.mxu0 %v1261_v10  ;;  %v1278_v27 = vld [vmem:[#allocation2 + $0x88] sm:$0xff]   ;;  %v1282_v31 = vld [vmem:[#allocation2 + $0x80] sm:$0xff]   ;;  %v1285_v42 = vld [vmem:[#allocation2 + $0x138] sm:$0xff]  }
  0x19   :  { %1127 = vmatpush3.bf16.msra.mxu1 %v1262_v11  ;;  %1106 = vmatprep.subr.bf16.mxu0 %v1263_v12  ;;  %v41_v32 = vld [vmem:[%s1506_s0] sm:$0xff]  ;;  %v42_v34 = vld [vmem:[%s1506_s0 + $0x8] sm:$0xff]  ;;  %v1286_v43 = vld [vmem:[#allocation2 + $0x1b8] sm:$0xff]  }
  0x1a   :  { %1128 = vmatprep.subr.bf16.mxu1 %v1264_v13  ;;  %v45_v33 = vld [vmem:[%s1506_s0 + $0x20] sm:$0xff]  ;;  %v46_v37 = vld [vmem:[%s1506_s0 + $0x28] sm:$0xff]  ;;  %v1287_v44 = vld [vmem:[#allocation2 + $0x170] sm:$0xff]  }
  0x1b   :  { %v1010_v35 = vcombine.low %v41_v32, %v45_v33  ;;  %v1011_v36 = vcombine.high %v41_v32, %v45_v33  ;;  %v1012_v38 = vcombine.low %v42_v34, %v46_v37  ;;  %v1013_v39 = vcombine.high %v42_v34, %v46_v37  ;;  %v1288_v45 = vld [vmem:[#allocation2 + $0x1f0] sm:$0xff]   ;;  %v1291_v48 = vld [vmem:[#allocation2 + $0x168] sm:$0xff]   ;;  %v1295_v52 = vld [vmem:[#allocation2 + $0x160] sm:$0xff]  }
  0x1c   :  { %1107 = vmatpush3.bf16.msra.mxu0 %v1265_v14  ;;  %v1289_v46 = vld [vmem:[#allocation2 + $0x130] sm:$0xff]   ;;  %v1292_v49 = vld [vmem:[#allocation2 + $0x1e8] sm:$0xff]   ;;  %v1296_v53 = vld [vmem:[#allocation2 + $0x1e0] sm:$0xff]  }
  0x1d   :  { %1129 = vmatpush3.bf16.msra.mxu1 %v1266_v15  ;;  %1108 = vmatprep.subr.bf16.mxu0 %v1267_v16  ;;  %v1290_v47 = vld [vmem:[#allocation2 + $0x1b0] sm:$0xff]   ;;  %v1293_v50 = vld [vmem:[#allocation2 + $0x128] sm:$0xff]   ;;  %v1297_v54 = vld [vmem:[#allocation2 + $0x120] sm:$0xff]  }
  0x1e   :  { %1130 = vmatprep.subr.bf16.mxu1 %v1268_v17  ;;  %640 = vmatprep.mubr.bf16.mxu0 %v1011_v36  ;;  %v1294_v51 = vld [vmem:[#allocation2 + $0x1a8] sm:$0xff]   ;;  %v1298_v55 = vld [vmem:[#allocation2 + $0x1a0] sm:$0xff]   ;;  %v1299_v56 = vld [vmem:[#allocation2 + $0x158] sm:$0xff]   ;;  %v1356_v17 = vmov 0.0  }
  0x1f   :  { %681 = vmatprep.mubr.bf16.mxu1 %v1013_v39  ;;  %v1300_v57 = vld [vmem:[#allocation2 + $0x1d8] sm:$0xff]   ;;  %v1303_v60 = vld [vmem:[#allocation2 + $0x150] sm:$0xff]   ;;  %v1307_v0 = vld [vmem:[#allocation2 + $0x148] sm:$0xff]  }
  0x20   :  { %1109 = vmatpush3.bf16.msra.mxu0 %v1269_v18  ;;  %v1301_v58 = vld [vmem:[#allocation2 + $0x118] sm:$0xff]   ;;  %v1304_v61 = vld [vmem:[#allocation2 + $0x1d0] sm:$0xff]   ;;  %v1308_v1 = vld [vmem:[#allocation2 + $0x1c8] sm:$0xff]  }
  0x21   :  { %1131 = vmatpush3.bf16.msra.mxu1 %v1270_v19  ;;  %1110 = vmatprep.subr.bf16.mxu0 %v1271_v20  ;;  %v1302_v59 = vld [vmem:[#allocation2 + $0x198] sm:$0xff]   ;;  %v1305_v62 = vld [vmem:[#allocation2 + $0x110] sm:$0xff]   ;;  %v1309_v2 = vld [vmem:[#allocation2 + $0x108] sm:$0xff]  }
  0x22   :  { %1132 = vmatprep.subr.bf16.mxu1 %v1272_v21  ;;  %v1306_v63 = vld [vmem:[#allocation2 + $0x190] sm:$0xff]   ;;  %v1310_v3 = vld [vmem:[#allocation2 + $0x188] sm:$0xff]   ;;  %v1311_v4 = vld [vmem:[#allocation2 + $0x140] sm:$0xff]  }
  0x23   :  { %v1312_v5 = vld [vmem:[#allocation2 + $0x1c0] sm:$0xff]   ;;  %v43_v8 = vld [vmem:[%s1506_s0 + $0x10] sm:$0xff]  ;;  %v44_v12 = vld [vmem:[%s1506_s0 + $0x18] sm:$0xff] }
  0x24   :  { %1111 = vmatpush3.bf16.msra.mxu0 %v1273_v22  ;;  %v1313_v6 = vld [vmem:[#allocation2 + $0x100] sm:$0xff]   ;;  %v47_v9 = vld [vmem:[%s1506_s0 + $0x30] sm:$0xff]  ;;  %v48_v13 = vld [vmem:[%s1506_s0 + $0x38] sm:$0xff] }
  0x25   :  { %1133 = vmatpush3.bf16.msra.mxu1 %v1274_v23  ;;  %1112 = vmatprep.subr.bf16.mxu0 %v1275_v24  ;;  %v1314_v7 = vld [vmem:[#allocation2 + $0x180] sm:$0xff]   ;;  %v1014_v10 = vcombine.low %v43_v8, %v47_v9  ;;  %v1015_v11 = vcombine.high %v43_v8, %v47_v9  ;;  %v1016_v14 = vcombine.low %v44_v12, %v48_v13  ;;  %v1315_v16 = vld [vmem:[%s1509_s3 + $0x38] sm:$0xff]   ;;  %v1316_v18 = vld [vmem:[%s1509_s3 + $0x30] sm:$0xff]  }
  0x26   :  { %1134 = vmatprep.subr.bf16.mxu1 %v1276_v25  ;;  %v1017_v15 = vcombine.high %v44_v12, %v48_v13  ;;  %v1317_v19 = vld [vmem:[%s1509_s3 + $0x28] sm:$0xff]   ;;  %v1318_v20 = vld [vmem:[%s1509_s3 + $0x20] sm:$0xff]   ;;  %v1319_v21 = vld [vmem:[%s1509_s3 + $0x18] sm:$0xff]  }
  0x27   :  { %v1320_v22 = vld [vmem:[%s1509_s3 + $0x10] sm:$0xff]   ;;  %v1321_v23 = vld [vmem:[%s1509_s3 + $0x8] sm:$0xff]   ;;  %v1322_v24 = vld [vmem:[%s1509_s3] sm:$0xff]  }
  0x28   :  { %1113 = vmatpush3.bf16.msra.mxu0 %v1277_v26  ;;  %v1323_v25 = vld [vmem:[%s1511_s5 + $0x38] sm:$0xff]   ;;  %v1324_v26 = vld [vmem:[%s1511_s5 + $0x30] sm:$0xff]   ;;  %v1009_v37 = vld [vmem:[%s1508_s2] ss:$0 sm:$0xff] }
  0x29   :  { %1135 = vmatpush3.bf16.msra.mxu1 %v1278_v27  ;;  %1114 = vmatprep.subr.bf16.mxu0 %v1279_v28  ;;  %v1325_v27 = vld [vmem:[%s1511_s5 + $0x28] sm:$0xff]   ;;  %v1326_v28 = vld [vmem:[%s1511_s5 + $0x20] sm:$0xff]  }
  0x2a   :  { %1136 = vmatprep.subr.bf16.mxu1 %v1280_v29  ;;  %v1327_v29 = vld [vmem:[%s1511_s5 + $0x18] sm:$0xff]  }
  0x2c   :  { %1115 = vmatpush3.bf16.msra.mxu0 %v1281_v30 }
  0x2d   :  { %1137 = vmatpush3.bf16.msra.mxu1 %v1282_v31  ;;  %1144 = vmatprep.subr.bf16.mxu0 %v1283_v40 }
  0x2e   :  { %1166 = vmatprep.subr.bf16.mxu1 %v1284_v41 }
  0x2f   :  { %641 = vmatmul.mubr.bf16.vlgmr.msra.gmra.mxu0 %v1010_v35 }
  0x30   :  { %682 = vmatmul.mubr.bf16.vlgmr.msra.gmra.mxu1 %v1012_v38  ;;  %1145 = vmatpush3.bf16.msra.mxu0 %v1285_v42 }
  0x31   :  { %1167 = vmatpush3.bf16.msra.mxu1 %v1286_v43  ;;  %1146 = vmatprep.subr.bf16.mxu0 %v1287_v44 }
  0x32   :  { %1168 = vmatprep.subr.bf16.mxu1 %v1288_v45  ;;  %722 = vmatprep.mubr.bf16.mxu0 %v1015_v11 }
  0x33   :  { %763 = vmatprep.mubr.bf16.mxu1 %v1017_v15  ;;  %v1091_v15 = vld [vmem:[%s1512_s6] ss:$0 sm:$0xff] }
  0x34   :  { %1147 = vmatpush3.bf16.msra.mxu0 %v1289_v46 }
  0x35   :  { %1169 = vmatpush3.bf16.msra.mxu1 %v1290_v47  ;;  %1148 = vmatprep.subr.bf16.mxu0 %v1291_v48 }
  0x36   :  { %1170 = vmatprep.subr.bf16.mxu1 %v1292_v49 }
  0x38   :  { %1149 = vmatpush3.bf16.msra.mxu0 %v1293_v50 }
  0x39   :  { %1171 = vmatpush3.bf16.msra.mxu1 %v1294_v51  ;;  %1150 = vmatprep.subr.bf16.mxu0 %v1295_v52 }
  0x3a   :  { %1172 = vmatprep.subr.bf16.mxu1 %v1296_v53 }
  0x3c   :  { %1151 = vmatpush3.bf16.msra.mxu0 %v1297_v54 }
  0x3d   :  { %1173 = vmatpush3.bf16.msra.mxu1 %v1298_v55  ;;  %1152 = vmatprep.subr.bf16.mxu0 %v1299_v56 }
  0x3e   :  { %1174 = vmatprep.subr.bf16.mxu1 %v1300_v57 }
  0x40   :  { %1153 = vmatpush3.bf16.msra.mxu0 %v1301_v58 }
  0x41   :  { %1175 = vmatpush3.bf16.msra.mxu1 %v1302_v59  ;;  %1154 = vmatprep.subr.bf16.mxu0 %v1303_v60 }
  0x42   :  { %1176 = vmatprep.subr.bf16.mxu1 %v1304_v61 }
  0x44   :  { %1155 = vmatpush3.bf16.msra.mxu0 %v1305_v62 }
  0x45   :  { %1177 = vmatpush3.bf16.msra.mxu1 %v1306_v63  ;;  %1156 = vmatprep.subr.bf16.mxu0 %v1307_v0 }
  0x46   :  { %1178 = vmatprep.subr.bf16.mxu1 %v1308_v1 }
  0x48   :  { %1157 = vmatpush3.bf16.msra.mxu0 %v1309_v2  ;;  %v1328_v2 = vld [vmem:[%s1511_s5 + $0x10] sm:$0xff]  }
  0x49   :  { %1179 = vmatpush3.bf16.msra.mxu1 %v1310_v3  ;;  %1158 = vmatprep.subr.bf16.mxu0 %v1311_v4  ;;  %v1329_v3 = vld [vmem:[%s1511_s5 + $0x8] sm:$0xff]   ;;  %v1330_v4 = vld [vmem:[%s1511_s5] sm:$0xff]  }
  0x4a   :  { %1180 = vmatprep.subr.bf16.mxu1 %v1312_v5  ;;  %v1082_v5 = vld [vmem:[%s1510_s4] ss:$0 sm:$0xff] }
  0x4c   :  { %1159 = vmatpush3.bf16.msra.mxu0 %v1313_v6 }
  0x4d   :  { %1181 = vmatpush3.bf16.msra.mxu1 %v1314_v7  ;;  %1206 = vmatprep.subr.bf16.mxu0 %v1356_v17 }
  0x4e   :  { %1226 = vmatprep.subr.bf16.mxu1 %v1356_v17 }
  0x4f   :  { %723 = vmatmul.mubr.bf16.vlgmr.msra.gmra.mxu0 %v1014_v10 }
  0x50   :  { %764 = vmatmul.mubr.bf16.vlgmr.msra.gmra.mxu1 %v1016_v14  ;;  %1207 = vmatpush3.bf16.msra.mxu0 %v1315_v16 }
  0x51   :  { %1208 = vmatprep.subr.bf16.mxu0 %v1356_v17  ;;  %1222 = vmatprep.mubr.msk.bf16.mxu0 %vm1357_vm0, %v1356_v17 }
  0x52   :  { %1242 = vmatprep.mubr.msk.bf16.mxu1 %vm1357_vm0, %v1356_v17  ;;  %1227 = vmatpush3.bf16.msra.mxu1 %v1323_v25 }
  0x53   :  { %1228 = vmatprep.subr.bf16.mxu1 %v1356_v17 }
  0x54   :  { %1209 = vmatpush3.bf16.msra.mxu0 %v1316_v18 }
  0x55   :  { %1210 = vmatprep.subr.bf16.mxu0 %v1356_v17 }
  0x56   :  { %1229 = vmatpush3.bf16.msra.mxu1 %v1324_v26 }
  0x57   :  { %1230 = vmatprep.subr.bf16.mxu1 %v1356_v17 }
  0x58   :  { %1211 = vmatpush3.bf16.msra.mxu0 %v1317_v19 }
  0x59   :  { %1212 = vmatprep.subr.bf16.mxu0 %v1356_v17 }
  0x5a   :  { %1231 = vmatpush3.bf16.msra.mxu1 %v1325_v27 }
  0x5b   :  { %1232 = vmatprep.subr.bf16.mxu1 %v1356_v17 }
  0x5c   :  { %1213 = vmatpush3.bf16.msra.mxu0 %v1318_v20 }
  0x5d   :  { %1214 = vmatprep.subr.bf16.mxu0 %v1356_v17 }
  0x5e   :  { %1233 = vmatpush3.bf16.msra.mxu1 %v1326_v28 }
  0x5f   :  { %1234 = vmatprep.subr.bf16.mxu1 %v1356_v17 }
  0x60   :  { %1215 = vmatpush3.bf16.msra.mxu0 %v1319_v21 }
  0x61   :  { %1216 = vmatprep.subr.bf16.mxu0 %v1356_v17 }
  0x62   :  { %1235 = vmatpush3.bf16.msra.mxu1 %v1327_v29 }
  0x63   :  { %1236 = vmatprep.subr.bf16.mxu1 %v1356_v17 }
  0x64   :  { %1217 = vmatpush3.bf16.msra.mxu0 %v1320_v22 }
  0x65   :  { %1218 = vmatprep.subr.bf16.mxu0 %v1356_v17 }
  0x66   :  { %1237 = vmatpush3.bf16.msra.mxu1 %v1328_v2 }
  0x67   :  { %1238 = vmatprep.subr.bf16.mxu1 %v1356_v17 }
  0x68   :  { %1219 = vmatpush3.bf16.msra.mxu0 %v1321_v23 }
  0x69   :  { %1220 = vmatprep.subr.bf16.mxu0 %v1356_v17 }
  0x6a   :  { %1239 = vmatpush3.bf16.msra.mxu1 %v1329_v3 }
  0x6b   :  { %1240 = vmatprep.subr.bf16.mxu1 %v1356_v17 }
  0x6c   :  { %1221 = vmatpush3.bf16.msra.mxu0 %v1322_v24 }
  0x6e   :  { %1241 = vmatpush3.bf16.msra.mxu1 %v1330_v4 }
  0xef   :  { %v1116_v30 = vpop.f32.mrf.mxu0 }
  0xf0   :  { %v1138_v31 = vpop.f32.mrf.mxu1 }
  0xf1   :  { %v1117_v32 = vpop.f32.mrf.mxu0 }
  0xf2   :  { %v1139_v33 = vpop.f32.mrf.mxu1  ;;  %v1118_v35 = vadd.f32 %v1117_v32, %v1116_v30 }
  0xf3   :  { %v1119_v34 = vpop.f32.mrf.mxu0  ;;  %v1140_v40 = vadd.f32 %v1139_v33, %v1138_v31 }
  0xf4   :  { %v1141_v36 = vpop.f32.mrf.mxu1  ;;  %v643_v39 = vadd.f32 %v1118_v35, %v1009_v37 }
  0xf5   :  { %v1120_v38 = vpop.f32.mrf.mxu0 }
  0xf6   :  { %v1121_v41 = vadd.f32 %v1120_v38, %v1119_v34  ;;  %v1142_v42 = vpop.f32.mrf.mxu1  ;;  %v684_v46 = vadd.f32 %v1140_v40, %v643_v39 }
  0xf7   :  { %v1143_v51 = vadd.f32 %v1142_v42, %v1141_v36 }
  0xf8   :  { %v646_v47 = vadd.f32 %v1121_v41, %v1009_v37 }
  0xfa   :  { %v687_v55 = vadd.f32 %v1143_v51, %v646_v47 }
 0x10f   :  { %v1160_v43 = vpop.f32.mrf.mxu0 }
 0x110   :  { %v1182_v44 = vpop.f32.mrf.mxu1 }
 0x111   :  { %v1161_v45 = vpop.f32.mrf.mxu0 }
 0x112   :  { %v1162_v48 = vadd.f32 %v1161_v45, %v1160_v43  ;;  %v1183_v49 = vpop.f32.mrf.mxu1 }
 0x113   :  { %v1163_v50 = vpop.f32.mrf.mxu0  ;;  %v1184_v56 = vadd.f32 %v1183_v49, %v1182_v44 }
 0x114   :  { %v725_v52 = vadd.f32 %v1162_v48, %v684_v46  ;;  %v1185_v53 = vpop.f32.mrf.mxu1 }
 0x115   :  { %v1164_v54 = vpop.f32.mrf.mxu0 }
 0x116   :  { %v1165_v57 = vadd.f32 %v1164_v54, %v1163_v50  ;;  %v1186_v58 = vpop.f32.mrf.mxu1  ;;  %v766_v59 = vadd.f32 %v1184_v56, %v725_v52 }
 0x117   :  { %v1187_v61 = vadd.f32 %v1186_v58, %v1185_v53 }
 0x118   :  { %v728_v60 = vadd.f32 %v1165_v57, %v687_v55  ;;  %v772_v63 = vmax.f32 %v766_v59, 0.0 }
 0x11a   :  { %v769_v62 = vadd.f32 %v1187_v61, %v728_v60 }
 0x11c   :  { %v773_v0 = vmax.f32 %v769_v62, 0.0 }
 0x11e   :  { %v774_v1 = vpack.c.bf16 %v773_v0, %v772_v63 }
 0x120   :  { %1223 = vmatmul.mubr.bf16.vlgmr.msra.gmra.mxu0 %v774_v1 }
 0x1e0   :  { %v880_v6 = vpop.f32.mrf.mxu0 }
 0x1e1   :  { %v881_v8 = vadd.f32 %v1082_v5, %v880_v6 }
 0x1e2   :  { %v1224_v7 = vpop.f32.mrf.mxu0 }
 0x1e3   :  { %v887_v12 = vmax.f32 %v881_v8, 0.0 }
 0x1e4   :  { %v883_v9 = vpop.f32.mrf.mxu0 }
 0x1e5   :  { %v884_v10 = vadd.f32 %v1082_v5, %v883_v9 }
 0x1e6   :  { %v1225_v11 = vpop.f32.mrf.mxu0 }
 0x1e7   :  { %v888_v13 = vmax.f32 %v884_v10, 0.0 }
 0x1e9   :  { %v889_v14 = vpack.c.bf16 %v888_v13, %v887_v12 }
 0x1eb   :  { %1243 = vmatmul.mubr.bf16.vlgmr.msra.gmra.mxu1 %v889_v14 }
 0x2ab   :  { %v995_v16 = vpop.f32.mrf.mxu1 }
 0x2ac   :  { %v996_v17 = vadd.f32 %v1091_v15, %v995_v16 }
 0x2ad   :  { %v1244_v18 = vpop.f32.mrf.mxu1 }
 0x2ae   :  { %1002 = vst [vmem:[%s1513_s7] sm:$0xff] %v996_v17 }
 0x2af   :  { %v998_v19 = vpop.f32.mrf.mxu1 }
 0x2b0   :  { %v999_v20 = vadd.f32 %v1091_v15, %v998_v19 }
 0x2b1   :  { %v1245_v21 = vpop.f32.mrf.mxu1 }
 0x2b2   :  { %1003 = vst [vmem:[%s1513_s7 + $0x8] sm:$0xff] %v999_v20 }
 0x2b3   :  { %1008 = vsyncpa [#allocation3], 1 }

</bundles_post_ra>
